<compile_context>
chip_gen: v7x
topology: tpu7x:2x2x1
jax: 0.10.0
libtpu: 0.0.40
codegen_flags: <defaults>
</compile_context>

<pallas_src>
import functools

import numpy as np
import jax
import jax.numpy as jnp
from jax import lax
from jax.experimental import pallas as pl
from jax.experimental.pallas import tpu as pltpu

THETA = 1.0
LANE = 128      # lane width (last dim)
SUBLANE = 8     # sublane width (second-to-last dim)


def _round_up(x, m):
    return (x + m - 1) // m * m


def _vmem_limit_bytes(*arrays, extra_bytes=0):
    """Explicit scoped-VMEM limit: ~2x the resident operands (headroom for
    double-buffered IO + intermediates), clamped to sane bounds."""
    b = sum(int(np.prod(a.shape)) * a.dtype.itemsize for a in arrays) + extra_bytes
    return int(min(max(2 * b + (1 << 20), 32 << 20), 100 << 20))


# ---------------------------------------------------------------------------
# Kernels (single invocation, all operands whole-array resident in VMEM)
# ---------------------------------------------------------------------------
def kirchhoff_kernel(mt_ref, ms_ref, v_ref, t2_ref, out_ref):
    """One derivative evaluation: out = f(v).

    mt_ref: (N_pad, E_pad)  M^T with cond*theta1 folded into its columns
    ms_ref: (E_pad, N_pad)  -M/theta
    t2_ref: (1, E_pad)      cond*theta2
    """
    diff = jnp.dot(v_ref[...].astype(mt_ref.dtype), mt_ref[...],
                   preferred_element_type=jnp.float32)             # (B, E)
    cur = jnp.maximum(diff + t2_ref[...], 0.0)                     # (B, E)
    out_ref[...] = jnp.dot(cur.astype(ms_ref.dtype), ms_ref[...],
                           preferred_element_type=jnp.float32)     # (B, N)


def euler_kernel(mt_ref, ms_ref, v0_ref, t2_ref, dt_ref, vout_ref, *,
                 num_steps, unroll):
    """All `num_steps` explicit-Euler steps fused into one in-kernel loop."""
    # Hoist loads / broadcasts out of the time loop.
    mt = mt_ref[...]
    ms = ms_ref[...]
    t2 = jnp.broadcast_to(t2_ref[...], (v0_ref.shape[0], t2_ref.shape[1]))
    dt = dt_ref[0]           # SMEM scalar
    v0 = v0_ref[...]

    def step(_, v):
        diff = jnp.dot(v.astype(mt.dtype), mt, preferred_element_type=jnp.float32)
        cur = jnp.maximum(diff + t2, 0.0)
        dv = jnp.dot(cur.astype(ms.dtype), ms, preferred_element_type=jnp.float32)
        return v + dt * dv

    vout_ref[...] = lax.fori_loop(0, num_steps, step, v0, unroll=unroll)


# ---------------------------------------------------------------------------
# Host-side operand preparation (done ONCE, cached in the wrapper object)
# ---------------------------------------------------------------------------
def _prepare(m, theta_sd_1, theta_sd_2, cond, theta, mxu_dtype):
    m = np.asarray(m, np.float32)
    E, N = m.shape
    E_pad = _round_up(max(E, 1), LANE)
    N_pad = _round_up(max(N, 1), LANE)
    t1 = np.asarray(theta_sd_1, np.float32)
    t2 = np.asarray(theta_sd_2, np.float32)
    cd = np.asarray(cond, np.float32)

    # M^T with cond*theta1 folded into column e (cond >= 0, so the relu fold is valid).
    mt_scaled = np.zeros((N_pad, E_pad), np.float32)
    mt_scaled[:N, :E] = m.T * (cd * t1)[None, :]
    # -M/theta (sign and 1/theta folded; zero-padding keeps padded edges/nodes inert).
    ms = np.zeros((E_pad, N_pad), np.float32)
    ms[:E, :N] = -m / float(theta)
    # cond*theta2 bias.
    t2p = np.zeros((1, E_pad), np.float32)
    t2p[0, :E] = cd * t2

    return (jnp.asarray(mt_scaled, mxu_dtype),
            jnp.asarray(ms, mxu_dtype),
            jnp.asarray(t2p, jnp.float32))


# ---------------------------------------------------------------------------
# Jitted callers
# ---------------------------------------------------------------------------
@jax.jit
def _forward_call(mt, ms, t2, v):
    B, N = v.shape
    N_pad, E_pad = mt.shape
    B_pad = max(_round_up(B, SUBLANE), SUBLANE)
    v_pad = jnp.zeros((B_pad, N_pad), jnp.float32).at[:B, :N].set(v.astype(jnp.float32))
    out = pl.pallas_call(
        kirchhoff_kernel,
        out_shape=jax.ShapeDtypeStruct((B_pad, N_pad), jnp.float32),
        in_specs=[pl.BlockSpec(memory_space=pltpu.MemorySpace.VMEM)] * 4,
        out_specs=pl.BlockSpec(memory_space=pltpu.MemorySpace.VMEM),
        compiler_params=pltpu.CompilerParams(
            vmem_limit_bytes=_vmem_limit_bytes(
                mt, ms, v_pad, t2,
                extra_bytes=B_pad * (N_pad + 2 * E_pad) * 4)),
    )(mt, ms, v_pad, t2)
    return out[:B, :N]


@functools.partial(jax.jit, static_argnames=("num_steps", "unroll"))
def _integrate_call(mt, ms, t2, v0, dt, *, num_steps, unroll):
    B, N = v0.shape
    N_pad, E_pad = mt.shape
    B_pad = max(_round_up(B, SUBLANE), SUBLANE)
    v0_pad = jnp.zeros((B_pad, N_pad), jnp.float32).at[:B, :N].set(v0.astype(jnp.float32))
    dt_arr = jnp.asarray(dt, jnp.float32).reshape((1,))
    kernel = functools.partial(euler_kernel, num_steps=num_steps, unroll=unroll)
    out = pl.pallas_call(
        kernel,
        out_shape=jax.ShapeDtypeStruct((B_pad, N_pad), jnp.float32),
        in_specs=[
            pl.BlockSpec(memory_space=pltpu.MemorySpace.VMEM),   # M^T (cond*theta1 folded)
            pl.BlockSpec(memory_space=pltpu.MemorySpace.VMEM),   # -M/theta
            pl.BlockSpec(memory_space=pltpu.MemorySpace.VMEM),   # v0
            pl.BlockSpec(memory_space=pltpu.MemorySpace.VMEM),   # cond*theta2
            pl.BlockSpec(memory_space=pltpu.MemorySpace.SMEM),   # dt scalar
        ],
        out_specs=pl.BlockSpec(memory_space=pltpu.MemorySpace.VMEM),
        input_output_aliases={2: 0},   # alias v0 -> v_out (saves one operand DMA)
        compiler_params=pltpu.CompilerParams(
            vmem_limit_bytes=_vmem_limit_bytes(
                mt, ms, v0_pad, t2,
                extra_bytes=B_pad * (N_pad + 2 * E_pad) * 4)),
    )(mt, ms, v0_pad, t2, dt_arr)
    return out[:B, :N]


# ---------------------------------------------------------------------------
# Module-equivalent wrapper (prep cached once; calls are jitted)
# ---------------------------------------------------------------------------
class KirchhoffNetPallas:
    def __init__(self, m, theta_sd_1, theta_sd_2, cond, theta=THETA,
                 mxu_dtype=jnp.float32):
        # mxu_dtype=jnp.bfloat16: halves resident VMEM for the incidence
        # matrices and doubles MXU rate on v6e/v7x; elementwise math and the
        # carried state stay f32 (v5e has no bf16 VPU).
        self.mt, self.ms, self.t2 = _prepare(m, theta_sd_1, theta_sd_2, cond,
                                             theta, mxu_dtype)

    def __call__(self, t, v):
        """dv/dt = f(t, v); `t` is unused, exactly as in the PyTorch module.
        v may be (N,) (module semantics) or (B, N) (batched states)."""
        del t
        single = v.ndim == 1
        V = v.reshape(1, -1) if single else v
        out = _forward_call(self.mt, self.ms, self.t2, V)
        return out[0] if single else out

    forward = __call__

    def integrate(self, v0, dt, num_steps, unroll=True):
        """`num_steps` explicit-Euler steps fused into a single pallas_call."""
        single = v0.ndim == 1
        V0 = v0.reshape(1, -1) if single else v0
        out = _integrate_call(self.mt, self.ms, self.t2, V0,
                              jnp.asarray(dt, jnp.float32),
                              num_steps=int(num_steps), unroll=unroll)
        return out[0] if single else out


# ---------------------------------------------------------------------------
# Test harness
# ---------------------------------------------------------------------------
def build_graph(num_nodes):
    """Deterministic synthetic DiGraph: (src, dst, resistance) triples."""
    edges = []
    for i in range(num_nodes):
        edges.append((i, (i + 1) % num_nodes, 1.0 + 0.25 * i))
        edges.append((i, (i + 5) % num_nodes, 2.0 + 0.125 * i))
    s, d, _ = edges[3]
    edges[3] = (s, d, 0.0)  # exercise the resistance==0 -> conductance==0 branch
    return edges


def reference_forward(v_np, edges, t1_np, t2_np, num_nodes):
    """Direct transliteration of the PyTorch loop (numpy, float64)."""
    dv = np.zeros_like(v_np)
    for n in range(num_nodes):
        incoming = 0.0
        outgoing = 0.0
        for e, (src, dst, r) in enumerate(edges):
            cond = 1.0 / r if r != 0 else 0.0
            g = max(t1_np[e] * (v_np[src] - v_np[dst]) + t2_np[e], 0.0)
            if dst == n:
                incoming += cond * g
            if src == n:
                outgoing += cond * g
        dv[n] = (incoming - outgoing) / THETA
    return dv


if __name__ == "__main__":
    num_nodes = 16
    edges = build_graph(num_nodes)
    E = len(edges)

    # Signed incidence matrix M (E, N) and conductances.
    m_np = np.zeros((E, num_nodes), dtype=np.float32)
    cond_np = np.zeros((E,), dtype=np.float32)
    for e, (src, dst, r) in enumerate(edges):
        m_np[e, src] += 1.0
        m_np[e, dst] -= 1.0
        cond_np[e] = (1.0 / r) if r != 0 else 0.0

    key = jax.random.PRNGKey(0)
    k1, k2, k3, k4 = jax.random.split(key, 4)
    theta_sd_1 = 0.1 * jax.random.normal(k1, (E,), dtype=jnp.float32)
    theta_sd_2 = 0.1 * jax.random.normal(k2, (E,), dtype=jnp.float32)
    v_single = jax.random.normal(k3, (num_nodes,), dtype=jnp.float32)
    v_batch = jax.random.normal(k4, (8, num_nodes), dtype=jnp.float32)
    t = jnp.float32(0.0)

    net = KirchhoffNetPallas(m_np, theta_sd_1, theta_sd_2, cond_np, theta=THETA)

    t1_64 = np.asarray(theta_sd_1, np.float64)
    t2_64 = np.asarray(theta_sd_2, np.float64)

    # 1) Module-equivalent single-state forward.
    dv = jax.block_until_ready(net(t, v_single))
    ref = reference_forward(np.asarray(v_single, np.float64), edges, t1_64, t2_64, num_nodes)
    np.testing.assert_allclose(np.asarray(dv), ref, rtol=1e-4, atol=1e-5)

    # 2) Batched forward.
    dv_b = jax.block_until_ready(net(t, v_batch))
    ref_b = np.stack([
        reference_forward(np.asarray(v_batch[b], np.float64), edges, t1_64, t2_64, num_nodes)
        for b in range(v_batch.shape[0])])
    np.testing.assert_allclose(np.asarray(dv_b), ref_b, rtol=1e-4, atol=1e-5)

    # 3) Fused explicit-Euler integration: all steps in ONE pallas_call (no grid).
    dt_step, num_steps = 0.05, 32
    v_end = jax.block_until_ready(net.integrate(v_batch, dt_step, num_steps))
    v_ref = np.asarray(v_batch, np.float64)
    for _ in range(num_steps):
        dv_step = np.stack([
            reference_forward(v_ref[b], edges, t1_64, t2_64, num_nodes)
            for b in range(v_ref.shape[0])])
        v_ref = v_ref + dt_step * dv_step
    np.testing.assert_allclose(np.asarray(v_end), v_ref, rtol=1e-3, atol=1e-4)

    print("KERNEL_OK")
</pallas_src>

<mosaic_0001>
module attributes {stable_mosaic.version = 11 : i64} {
  func.func @kirchhoff_kernel(%arg0: memref<128x128xf32, #tpu.memory_space<vmem>>, %arg1: memref<128x128xf32, #tpu.memory_space<vmem>>, %arg2: memref<8x128xf32, #tpu.memory_space<vmem>>, %arg3: memref<1x128xf32, #tpu.memory_space<vmem>>, %arg4: memref<8x128xf32, #tpu.memory_space<vmem>>) attributes {dimension_semantics = [], scalar_prefetch = 0 : i64, scratch_operands = 0 : i64, tpu.core_type = #tpu.core_type<tc>} {
    %c0 = arith.constant 0 : index
    %c0_0 = arith.constant 0 : index
    %0 = vector.load %arg2[%c0, %c0_0] : memref<8x128xf32, #tpu.memory_space<vmem>>, vector<8x128xf32>
    %c0_1 = arith.constant 0 : index
    %c0_2 = arith.constant 0 : index
    %1 = vector.load %arg0[%c0_1, %c0_2] : memref<128x128xf32, #tpu.memory_space<vmem>>, vector<128x128xf32>
    %cst = arith.constant dense<0.000000e+00> : vector<8x128xf32>
    %2 = tpu.matmul %0, %1, %cst {dimension_numbers = #tpu.dot_dimension_numbers<[1], [0], [0], [1], [0, 0, 1, 1], [], []>} : vector<8x128xf32>, vector<128x128xf32>, vector<8x128xf32> -> vector<8x128xf32>
    %c0_3 = arith.constant 0 : index
    %c0_4 = arith.constant 0 : index
    %3 = vector.load %arg3[%c0_3, %c0_4] : memref<1x128xf32, #tpu.memory_space<vmem>>, vector<1x128xf32>
    %4 = vector.broadcast %3 : vector<1x128xf32> to vector<8x128xf32>
    %5 = arith.addf %2, %4 : vector<8x128xf32>
    %cst_5 = arith.constant 0.000000e+00 : f32
    %6 = vector.broadcast %cst_5 : f32 to vector<8x128xf32>
    %7 = arith.maximumf %5, %6 : vector<8x128xf32>
    %c0_6 = arith.constant 0 : index
    %c0_7 = arith.constant 0 : index
    %8 = vector.load %arg1[%c0_6, %c0_7] : memref<128x128xf32, #tpu.memory_space<vmem>>, vector<128x128xf32>
    %cst_8 = arith.constant dense<0.000000e+00> : vector<8x128xf32>
    %9 = tpu.matmul %7, %8, %cst_8 {dimension_numbers = #tpu.dot_dimension_numbers<[1], [0], [0], [1], [0, 0, 1, 1], [], []>} : vector<8x128xf32>, vector<128x128xf32>, vector<8x128xf32> -> vector<8x128xf32>
    %c0_9 = arith.constant 0 : index
    %c0_10 = arith.constant 0 : index
    %10 = vector.load %arg4[%c0_9, %c0_10] : memref<8x128xf32, #tpu.memory_space<vmem>>, vector<8x128xf32>
    tpu.vector_store %arg4[%c0_9, %c0_10], %9 {strides = array<i32>} : memref<8x128xf32, #tpu.memory_space<vmem>>, vector<8x128xf32>,
    return
  }
}

</mosaic_0001>

<bundles_post_ra>
// kernel: _forward_call.1
= control target key start
LH: loop header
LB: loop body
LE: loop exit
PB: predicated region body
PF: predicated region fallthrough
CT: control target
= control target key end

     0   :  { %9 = vsyncpa [#allocation3], 0  ;;  %s522_s0 = inlined_call_operand.hbm [shape: f32[128,128], index: 0, kind: input, shape index: {}]   ;;  %s523_s1 = inlined_call_operand.hbm [shape: f32[128,128], index: 1, kind: input, shape index: {}]   ;;  %s524_s2 = inlined_call_operand.vmem [shape: f32[8,128], index: 2, kind: input, shape index: {}]   ;;  %s525_s3 = inlined_call_operand.vmem [shape: f32[1,128], index: 3, kind: input, shape index: {}]   ;;  %s526_s4 = inlined_call_operand.vmem [shape: f32[8,128], index: 4, kind: output, shape index: {}]  }
   0x1   :  { %10 = vsyncpa [#allocation5], 0  ;;  %s441_s15 = smov [#allocation2]   ;;  %s393_s19 = scalar_lea.hbm %s522_s0, 2048 }
   0x2   :  { %s16_s16 = sshll.u32 %s441_s15, 4  ;;  %p394_p0 = scmp.ne.s32.totalorder %s522_s0, %s393_s19  ;;  %s17_s16 = int_to_ptr.vmem [resolvable:$true] %s16_s16 }
   0x3   :  { %p397_p1 = scmp.lt.u32.totalorder %s393_s19, %s522_s0 }
   0x5   :  { %p399_p2 = pnand %p397_p1, %p394_p0 }
   0x7   :  { %402 = shalt.err (!%p399_p2)
}
   0x8   :  { %s403_s24 = scalar_lea.vmem %s17_s16, 2048  ;;  %p408_p4 = scmp.lt.s32.totalorder %s17_s16, %s17_s16 }
   0x9   :  { %p404_p3 = scmp.ne.s32.totalorder %s17_s16, %s403_s24  ;;  %p409_p5 = scmp.lt.s32.totalorder %s403_s24, %s403_s24 }
   0xb   :  { %p410_p6 = por %p409_p5, %p408_p4 }
   0xd   :  { %p411_p7 = pnand %p410_p6, %p404_p3 }
   0xf   :  { %414 = shalt.err (!%p411_p7)
}
  0x10   :  { %s442_s25 = smov 128   ;;  %s443_s26 = smov 8  }
  0x11   :  { %22 = dma.hbm_to_vmem [thread:$0]  %s522_s0, 2048, %s17_s16, [#allocation3], %s442_s25, %s442_s25, %s443_s26  }
  0x12   :  { %s444_s29 = smov [#allocation4]   ;;  %s415_s7 = scalar_lea.hbm %s523_s1, 2048 }
  0x13   :  { %s28_s30 = sshll.u32 %s444_s29, 4  ;;  %p416_p8 = scmp.ne.s32.totalorder %s523_s1, %s415_s7  ;;  %s29_s30 = int_to_ptr.vmem [resolvable:$true] %s28_s30 }
  0x14   :  { %p419_p9 = scmp.lt.u32.totalorder %s415_s7, %s523_s1 }
  0x16   :  { %p421_p10 = pnand %p419_p9, %p416_p8 }
  0x18   :  { %424 = shalt.err (!%p421_p10)
}
  0x19   :  { %s425_s12 = scalar_lea.vmem %s29_s30, 2048  ;;  %p430_p12 = scmp.lt.s32.totalorder %s29_s30, %s29_s30 }
  0x1a   :  { %p426_p11 = scmp.ne.s32.totalorder %s29_s30, %s425_s12  ;;  %p431_p13 = scmp.lt.s32.totalorder %s425_s12, %s425_s12 }
  0x1c   :  { %p432_p0 = por %p431_p13, %p430_p12 }
  0x1e   :  { %p433_p1 = pnand %p432_p0, %p426_p11 }
  0x20   :  { %436 = shalt.err (!%p433_p1)
}
  0x21   :  { %34 = dma.hbm_to_vmem [thread:$0]  %s523_s1, 2048, %s29_s30, [#allocation5], %s442_s25, %s442_s25, %s443_s26  }
  0x22   :  { %437 = dma.done.wait [#allocation3], 2048  }
  0x23   :  { %438 = vsyncadd [#allocation3], 4294965248 }
  0x24   :  { %439 = dma.done.wait [#allocation5], 2048  }
  0x25   :  { %440 = vsyncadd [#allocation5], 4294965248  ;;  %v445_v0 = vmov 0.0|0.0   ;;  %vm446_vm0 = vmmov 0   ;;  %v447_v1 = vmov 0.0   ;;  %v46_v2 = vld [vmem:[#allocation2] sm:$0xff] }
  0x26   :  { %338 = vmatprep.subr.bf16.mxu0 %v445_v0  ;;  %300 = vmatprep.mubr.msk.f32.mxu0 %vm446_vm0, %v447_v1  ;;  %v47_v3 = vld [vmem:[#allocation2 + $0x8] sm:$0xff]  ;;  %v48_v4 = vld [vmem:[#allocation2 + $0x10] sm:$0xff]  ;;  %v49_v6 = vld [vmem:[#allocation2 + $0x18] sm:$0xff] }
  0x27   :  { %362 = vmatprep.subr.bf16.mxu1 %v445_v0  ;;  %335 = vmatprep.mubr.msk.f32.mxu1 %vm446_vm0, %v447_v1  ;;  %v339_v5 = vpack.c.bf16 %v47_v3, %v46_v2  ;;  %v342_v7 = vpack.c.bf16 %v49_v6, %v48_v4  ;;  %v50_v8 = vld [vmem:[#allocation2 + $0x20] sm:$0xff]  ;;  %v51_v9 = vld [vmem:[#allocation2 + $0x28] sm:$0xff]  ;;  %v142_v12 = vld [vmem:[#allocation4 + $0x10] sm:$0xff] }
  0x28   :  { %v140_v10 = vld [vmem:[#allocation4] sm:$0xff]  ;;  %v141_v11 = vld [vmem:[#allocation4 + $0x8] sm:$0xff]  ;;  %v143_v13 = vld [vmem:[#allocation4 + $0x18] sm:$0xff]  ;;  %v345_v14 = vpack.c.bf16 %v51_v9, %v50_v8 }
  0x29   :  { %340 = vmatpush3.bf16.msra.mxu0 %v339_v5  ;;  %v363_v15 = vpack.c.bf16 %v141_v11, %v140_v10  ;;  %v52_v16 = vld [vmem:[#allocation2 + $0x30] sm:$0xff]  ;;  %v53_v17 = vld [vmem:[#allocation2 + $0x38] sm:$0xff]  ;;  %v366_v18 = vpack.c.bf16 %v143_v13, %v142_v12  ;;  %v144_v19 = vld [vmem:[#allocation4 + $0x20] sm:$0xff] }
  0x2a   :  { %341 = vmatprep.subr.bf16.mxu0 %v445_v0  ;;  %v145_v20 = vld [vmem:[#allocation4 + $0x28] sm:$0xff]  ;;  %v348_v21 = vpack.c.bf16 %v53_v17, %v52_v16  ;;  %v54_v22 = vld [vmem:[#allocation2 + $0x40] sm:$0xff]  ;;  %v146_v25 = vld [vmem:[#allocation4 + $0x30] sm:$0xff] }
  0x2b   :  { %364 = vmatpush3.bf16.msra.mxu1 %v363_v15  ;;  %v55_v23 = vld [vmem:[#allocation2 + $0x48] sm:$0xff]  ;;  %v369_v24 = vpack.c.bf16 %v145_v20, %v144_v19  ;;  %v147_v26 = vld [vmem:[#allocation4 + $0x38] sm:$0xff]  ;;  %v56_v28 = vld [vmem:[#allocation2 + $0x50] sm:$0xff] }
  0x2c   :  { %365 = vmatprep.subr.bf16.mxu1 %v445_v0  ;;  %v351_v27 = vpack.c.bf16 %v55_v23, %v54_v22  ;;  %v57_v29 = vld [vmem:[#allocation2 + $0x58] sm:$0xff]  ;;  %v372_v30 = vpack.c.bf16 %v147_v26, %v146_v25  ;;  %v148_v31 = vld [vmem:[#allocation4 + $0x40] sm:$0xff]  ;;  %v149_v32 = vld [vmem:[#allocation4 + $0x48] sm:$0xff] }
  0x2d   :  { %343 = vmatpush3.bf16.msra.mxu0 %v342_v7  ;;  %v354_v33 = vpack.c.bf16 %v57_v29, %v56_v28  ;;  %v58_v34 = vld [vmem:[#allocation2 + $0x60] sm:$0xff]  ;;  %v59_v35 = vld [vmem:[#allocation2 + $0x68] sm:$0xff]  ;;  %v375_v36 = vpack.c.bf16 %v149_v32, %v148_v31  ;;  %v150_v37 = vld [vmem:[#allocation4 + $0x50] sm:$0xff] }
  0x2e   :  { %344 = vmatprep.subr.bf16.mxu0 %v445_v0  ;;  %v151_v38 = vld [vmem:[#allocation4 + $0x58] sm:$0xff]  ;;  %v357_v39 = vpack.c.bf16 %v59_v35, %v58_v34  ;;  %v60_v40 = vld [vmem:[#allocation2 + $0x70] sm:$0xff]  ;;  %v152_v43 = vld [vmem:[#allocation4 + $0x60] sm:$0xff] }
  0x2f   :  { %367 = vmatpush3.bf16.msra.mxu1 %v366_v18  ;;  %v61_v41 = vld [vmem:[#allocation2 + $0x78] sm:$0xff]  ;;  %v378_v42 = vpack.c.bf16 %v151_v38, %v150_v37  ;;  %v153_v44 = vld [vmem:[#allocation4 + $0x68] sm:$0xff]  ;;  %v45_v47 = vld [vmem:[%s524_s2] sm:$0xff] }
  0x30   :  { %368 = vmatprep.subr.bf16.mxu1 %v445_v0  ;;  %v360_v45 = vpack.c.bf16 %v61_v41, %v60_v40  ;;  %v381_v46 = vpack.c.bf16 %v153_v44, %v152_v43  ;;  %v154_v48 = vld [vmem:[#allocation4 + $0x70] sm:$0xff]  ;;  %v155_v49 = vld [vmem:[#allocation4 + $0x78] sm:$0xff]  ;;  %v233_v51 = vld [vmem:[%s525_s3] ss:$0 sm:$0xff] }
  0x31   :  { %346 = vmatpush3.bf16.msra.mxu0 %v345_v14  ;;  %v384_v50 = vpack.c.bf16 %v155_v49, %v154_v48 }
  0x32   :  { %347 = vmatprep.subr.bf16.mxu0 %v445_v0 }
  0x33   :  { %370 = vmatpush3.bf16.msra.mxu1 %v369_v24 }
  0x34   :  { %371 = vmatprep.subr.bf16.mxu1 %v445_v0 }
  0x35   :  { %349 = vmatpush3.bf16.msra.mxu0 %v348_v21 }
  0x36   :  { %350 = vmatprep.subr.bf16.mxu0 %v445_v0 }
  0x37   :  { %373 = vmatpush3.bf16.msra.mxu1 %v372_v30 }
  0x38   :  { %374 = vmatprep.subr.bf16.mxu1 %v445_v0 }
  0x39   :  { %352 = vmatpush3.bf16.msra.mxu0 %v351_v27 }
  0x3a   :  { %353 = vmatprep.subr.bf16.mxu0 %v445_v0 }
  0x3b   :  { %376 = vmatpush3.bf16.msra.mxu1 %v375_v36 }
  0x3c   :  { %377 = vmatprep.subr.bf16.mxu1 %v445_v0 }
  0x3d   :  { %355 = vmatpush3.bf16.msra.mxu0 %v354_v33 }
  0x3e   :  { %356 = vmatprep.subr.bf16.mxu0 %v445_v0 }
  0x3f   :  { %379 = vmatpush3.bf16.msra.mxu1 %v378_v42 }
  0x40   :  { %380 = vmatprep.subr.bf16.mxu1 %v445_v0 }
  0x41   :  { %358 = vmatpush3.bf16.msra.mxu0 %v357_v39 }
  0x42   :  { %359 = vmatprep.subr.bf16.mxu0 %v445_v0 }
  0x43   :  { %382 = vmatpush3.bf16.msra.mxu1 %v381_v46 }
  0x44   :  { %383 = vmatprep.subr.bf16.mxu1 %v445_v0 }
  0x45   :  { %361 = vmatpush3.bf16.msra.mxu0 %v360_v45 }
  0x47   :  { %385 = vmatpush3.bf16.msra.mxu1 %v384_v50 }
  0x48   :  { %301 = vmatmul.mubr.f32.vlgmr.msra.gmra.mrb[0].mxu0 %v45_v47 }
 0x11b   :  { %v135_v52 = vpop.f32.mrb[0].mxu0 }
 0x11c   :  { %v136_v53 = vadd.f32 %v233_v51, %v135_v52  ;;  %v302_v54 = vpop.f32.mrb[1].mxu0 }
 0x11e   :  { %v139_v55 = vmax.f32 %v136_v53, 0.0 }
 0x120   :  { %336 = vmatmul.mubr.f32.vlgmr.msra.gmra.mrb[0].mxu1 %v139_v55 }
 0x1f3   :  { %v222_v56 = vpop.f32.mrb[0].mxu1 }
 0x1f4   :  { %226 = vst [vmem:[%s526_s4] sm:$0xff] %v222_v56  ;;  %v337_v57 = vpop.f32.mrb[1].mxu1 }
 0x1f5   :  { %231 = vsyncpa [#allocation3], 1 }
 0x1f6   :  { %232 = vsyncpa [#allocation5], 1 }

</bundles_post_ra>
